<compile_context>
chip_gen: v7x
topology: tpu7x:2x2x1
jax: 0.10.0
libtpu: 0.0.40
codegen_flags: <defaults>
</compile_context>

<pallas_src>
import jax
import jax.numpy as jnp
from jax.experimental import pallas as pl
from jax.experimental.pallas import tpu as pltpu

_LANES = 1024                 # lane width of the aligned slab path (mult of 128 and of 4)
_JNP_FASTPATH_ELEMS = 16384   # below this many elements, kernel launch overhead dominates


# ----------------------------------------------------------------------------- kernel
def _clip_kernel(lower_ref, upper_ref, x_ref, o_ref):
    # lower/upper: (1, lanes) per-lane bounds, resident across the grid.
    # x/o: (row_block, lanes) lane-dense tiles -> unmasked full-lane loads/stores.
    o_ref[...] = jnp.minimum(jnp.maximum(x_ref[...], lower_ref[...]), upper_ref[...])


# ----------------------------------------------------------------------------- helpers
def _clip_jnp(boxes, height, width):
    """Tiny-input / fallback path: XLA fuses this into one mem-bound pass.

    Also covers integer dtypes and degenerate (empty) shapes.
    """
    x1 = jnp.maximum(boxes[:, :, 0], 0)
    y1 = jnp.maximum(boxes[:, :, 1], 0)
    x2 = jnp.minimum(boxes[:, :, 2], width)
    y2 = jnp.minimum(boxes[:, :, 3], height)
    return jnp.stack([x1, y1, x2, y2], axis=-1).astype(boxes.dtype)


def _target_block_bytes():
    """Per-block byte budget, gated on the chip's physical VMEM."""
    try:
        vmem = getattr(pltpu.get_tpu_info(), "vmem_capacity_bytes", 64 << 20)
    except Exception:  # not on TPU / API unavailable -> conservative default
        vmem = 64 << 20
    # v5e/v6e (128 MiB VMEM): 8 MiB blocks; v7x (64 MiB per TC): 4 MiB blocks.
    return (8 << 20) if vmem >= (100 << 20) else (4 << 20)


def _choose_row_block(n_rows, lanes, itemsize):
    """Pick a row block that divides n_rows and obeys the (8, lane) tiling rules."""
    row_bytes = lanes * itemsize
    target = _target_block_bytes()
    max_rows = max(8, (target // row_bytes) // 8 * 8)

    if n_rows <= max_rows:
        # Mid-size slabs: give the "parallel" grid axis >= 2 steps so v7x's two
        # TensorCores can both stream (only when the halves stay 8-row aligned).
        if n_rows % 16 == 0 and n_rows * row_bytes > (1 << 20):
            row_block = n_rows // 2
        else:
            row_block = n_rows
    else:
        row_block = None
        for cand in range(max_rows, 7, -8):   # largest multiple-of-8 divisor <= max_rows
            if n_rows % cand == 0:
                row_block = cand
                break

    if row_block is None or row_block * row_bytes > 2 * target:
        return None                            # no clean tiling -> caller falls back
    return row_block


# ----------------------------------------------------------------------------- wrapper
def clip_boxes_hw(boxes, height, width):
    """Clip (B, N, 4) boxes to [0, width] x [0, height]; height/width are Python ints."""
    B, N, C4 = boxes.shape
    assert C4 == 4, "boxes last dim must be 4 ([x1, y1, x2, y2])"
    total = B * N * 4
    itemsize = jnp.dtype(boxes.dtype).itemsize

    # Tiny / empty / integer-dtype inputs: fused jnp clamp (no +/-inf bound encoding needed).
    if total < _JNP_FASTPATH_ELEMS or not jnp.issubdtype(boxes.dtype, jnp.floating):
        return _clip_jnp(boxes, height, width)

    # Free contiguous reshape into a lane-dense 2D slab; no pad, no trailing slice.
    if total % _LANES == 0:
        slab = boxes.reshape(total // _LANES, _LANES)
    else:
        slab = boxes.reshape(B, N * 4)          # last dim still % 4 == 0, taken as full block
    n_rows, lanes = slab.shape

    row_block = _choose_row_block(n_rows, lanes, itemsize)
    if row_block is None:                       # awkward shape -> correct, fused fallback
        return _clip_jnp(boxes, height, width)

    # Per-lane clamp bounds.  Coordinate id of a flattened element is (lane & 3)
    # because every slab row starts at a multiple of 4.  Bounds are kept in the box
    # dtype to match torch.clamp's scalar->tensor-dtype conversion semantics.
    dt = boxes.dtype
    coord = jnp.arange(lanes, dtype=jnp.int32) & 3
    lower = jnp.where(coord < 2, jnp.zeros((), dt), jnp.array(-jnp.inf, dt))
    upper = jnp.where(coord == 2, jnp.array(float(width), dt),
                      jnp.where(coord == 3, jnp.array(float(height), dt),
                                jnp.array(jnp.inf, dt)))
    lower = lower.reshape(1, lanes).astype(dt)
    upper = upper.reshape(1, lanes).astype(dt)

    block_bytes = row_block * lanes * itemsize
    # 2 (in+out) x 2 (double buffer) x block + resident bounds, with headroom.
    vmem_limit = int(min(100 << 20,
                         max(32 << 20, 4 * block_bytes + 2 * lanes * itemsize + (4 << 20))))

    out_slab = pl.pallas_call(
        _clip_kernel,
        out_shape=jax.ShapeDtypeStruct(slab.shape, slab.dtype),
        grid=(n_rows // row_block,),
        in_specs=[
            pl.BlockSpec((1, lanes), lambda i: (0, 0)),          # lower (resident)
            pl.BlockSpec((1, lanes), lambda i: (0, 0)),          # upper (resident)
            pl.BlockSpec((row_block, lanes), lambda i: (i, 0)),  # boxes tile
        ],
        out_specs=pl.BlockSpec((row_block, lanes), lambda i: (i, 0)),
        compiler_params=pltpu.CompilerParams(
            dimension_semantics=("parallel",),
            vmem_limit_bytes=vmem_limit),
        cost_estimate=pl.CostEstimate(
            flops=2 * total,
            transcendentals=0,
            bytes_accessed=2 * total * itemsize + 2 * lanes * itemsize),
    )(lower, upper, slab)

    return out_slab.reshape(B, N, 4)


def clip_boxes(boxes, img):
    """Pallas equivalent of ClipBoxes.forward(boxes, img); only img's static shape is used."""
    _, _, height, width = img.shape
    return clip_boxes_hw(boxes, int(height), int(width))


# ----------------------------------------------------------------------------- reference / test
def _reference(boxes, height, width):
    ref = boxes
    ref = ref.at[:, :, 0].set(jnp.maximum(ref[:, :, 0], 0))
    ref = ref.at[:, :, 1].set(jnp.maximum(ref[:, :, 1], 0))
    ref = ref.at[:, :, 2].set(jnp.minimum(ref[:, :, 2], width))
    ref = ref.at[:, :, 3].set(jnp.minimum(ref[:, :, 3], height))
    return ref


if __name__ == "__main__":
    key = jax.random.PRNGKey(0)
    kb, ki, kb2, kb3 = jax.random.split(key, 4)

    # Case 1: shapes mirroring the module (NCHW image + small box set) -> jnp fast path.
    B, N = 2, 8
    C, H, W = 4, 16, 16
    boxes = jax.random.uniform(kb, (B, N, 4), dtype=jnp.float32, minval=-8.0, maxval=24.0)
    img = jax.random.normal(ki, (B, C, H, W), dtype=jnp.float32)
    out = jax.block_until_ready(clip_boxes(boxes, img))
    assert out.shape == boxes.shape and out.dtype == boxes.dtype
    assert jnp.allclose(out, _reference(boxes, H, W)), "mismatch (case 1)"

    # Case 2: 1024-aligned total -> Pallas (rows, 1024) slab path.
    B2, N2, H2, W2 = 2, 4096, 37, 53
    boxes2 = jax.random.uniform(kb2, (B2, N2, 4), dtype=jnp.float32, minval=-20.0, maxval=80.0)
    out2 = jax.block_until_ready(clip_boxes_hw(boxes2, H2, W2))
    assert jnp.allclose(out2, _reference(boxes2, H2, W2)), "mismatch (case 2)"

    # Case 3: non-aligned total -> Pallas (B, N*4) full-lane slab path (no pad, no slice).
    B3, N3, H3, W3 = 2, 4099, 29, 61
    boxes3 = jax.random.uniform(kb3, (B3, N3, 4), dtype=jnp.float32, minval=-20.0, maxval=80.0)
    out3 = jax.block_until_ready(clip_boxes_hw(boxes3, H3, W3))
    assert jnp.allclose(out3, _reference(boxes3, H3, W3)), "mismatch (case 3)"

    # TODO(synk): torch mutates `boxes` in place; the JAX version returns a new array.
    print("KERNEL_OK")
</pallas_src>

<mosaic_0001>
module attributes {stable_mosaic.version = 11 : i64} {
  func.func @_clip_kernel(%arg0: i32, %arg1: memref<1x1024xf32, #tpu.memory_space<vmem>>, %arg2: memref<1x1024xf32, #tpu.memory_space<vmem>>, %arg3: memref<32x1024xf32, #tpu.memory_space<vmem>>, %arg4: memref<32x1024xf32, #tpu.memory_space<vmem>>) attributes {dimension_semantics = [#tpu.dimension_semantics<parallel>], iteration_bounds = array<i64: 1>, scalar_prefetch = 0 : i64, scratch_operands = 0 : i64, tpu.core_type = #tpu.core_type<tc>, window_params = [{pipeline_mode = #tpu.pipeline_mode<synchronous>, transform_indices = @transform_0, window_bounds = array<i64: 1, 1024>}, {pipeline_mode = #tpu.pipeline_mode<synchronous>, transform_indices = @transform_1, window_bounds = array<i64: 1, 1024>}, {transform_indices = @transform_2, window_bounds = array<i64: 32, 1024>}, {transform_indices = @transform_3, window_bounds = array<i64: 32, 1024>}]} {
    %c0 = arith.constant 0 : index
    %c0_0 = arith.constant 0 : index
    %0 = vector.load %arg3[%c0, %c0_0] : memref<32x1024xf32, #tpu.memory_space<vmem>>, vector<32x1024xf32>
    %c0_1 = arith.constant 0 : index
    %c0_2 = arith.constant 0 : index
    %1 = vector.load %arg1[%c0_1, %c0_2] : memref<1x1024xf32, #tpu.memory_space<vmem>>, vector<1x1024xf32>
    %2 = vector.broadcast %1 : vector<1x1024xf32> to vector<32x1024xf32>
    %3 = arith.maximumf %0, %2 : vector<32x1024xf32>
    %c0_3 = arith.constant 0 : index
    %c0_4 = arith.constant 0 : index
    %4 = vector.load %arg2[%c0_3, %c0_4] : memref<1x1024xf32, #tpu.memory_space<vmem>>, vector<1x1024xf32>
    %5 = vector.broadcast %4 : vector<1x1024xf32> to vector<32x1024xf32>
    %6 = arith.minimumf %3, %5 : vector<32x1024xf32>
    %c0_5 = arith.constant 0 : index
    %c0_6 = arith.constant 0 : index
    %7 = vector.load %arg4[%c0_5, %c0_6] : memref<32x1024xf32, #tpu.memory_space<vmem>>, vector<32x1024xf32>
    tpu.vector_store %arg4[%c0_5, %c0_6], %6 {strides = array<i32>} : memref<32x1024xf32, #tpu.memory_space<vmem>>, vector<32x1024xf32>,
    return
  }
  func.func @transform_0(%arg0: i32) -> (i32, i32) {
    %c0_i32 = arith.constant 0 : i32
    %c0_i32_0 = arith.constant 0 : i32
    %c0_i32_1 = arith.constant 0 : i32
    return %c0_i32, %c0_i32_0 : i32, i32
  }
  func.func @transform_1(%arg0: i32) -> (i32, i32) {
    %c0_i32 = arith.constant 0 : i32
    %c0_i32_0 = arith.constant 0 : i32
    %c0_i32_1 = arith.constant 0 : i32
    return %c0_i32, %c0_i32_0 : i32, i32
  }
  func.func @transform_2(%arg0: i32) -> (i32, i32) {
    %c0_i32 = arith.constant 0 : i32
    %c0_i32_0 = arith.constant 0 : i32
    return %arg0, %c0_i32 : i32, i32
  }
  func.func @transform_3(%arg0: i32) -> (i32, i32) {
    %c0_i32 = arith.constant 0 : i32
    %c0_i32_0 = arith.constant 0 : i32
    return %arg0, %c0_i32 : i32, i32
  }
}

</mosaic_0001>

<bundles_post_ra>
// kernel: tpu_custom_call.1
= control target key start
LH: loop header
LB: loop body
LE: loop exit
PB: predicated region body
PF: predicated region fallthrough
CT: control target
= control target key end

     0   :  { %8 = vsyncpa [#allocation3], 0  ;;  %s558_s0 = inlined_call_operand.hbm [shape: f32[1,1024], index: 0, kind: input, shape index: {}]   ;;  %s559_s1 = inlined_call_operand.hbm [shape: f32[1,1024], index: 1, kind: input, shape index: {}]   ;;  %s560_s2 = inlined_call_operand.hbm [shape: f32[32,1024], index: 2, kind: input, shape index: {}]   ;;  %s561_s3 = inlined_call_operand.hbm [shape: f32[32,1024], index: 3, kind: output, shape index: {}]  }
   0x1   :  { %9 = vsyncpa [#allocation6], 0 }
   0x2   :  { %10 = vsyncpa [#allocation4], 0  ;;  %s382_s12 = smov [#allocation5]   ;;  %s383_s14 = smov [#allocation2]  }
   0x3   :  { %s27_s13 = sshll.u32 %s382_s12, 4  ;;  %s17_s15 = sshll.u32 %s383_s14, 4  ;;  %s28_s13 = int_to_ptr.vmem [resolvable:$true] %s27_s13  ;;  %s18_s15 = int_to_ptr.vmem [resolvable:$true] %s17_s15 }
   0x4   :  { %s288_s18 = scalar_lea.hbm %s559_s1, 128 }
   0x5   :  { %p289_p0 = scmp.ne.s32.totalorder %s559_s1, %s288_s18  ;;  %p292_p1 = scmp.lt.u32.totalorder %s288_s18, %s559_s1 }
   0x7   :  { %p294_p2 = pnand %p292_p1, %p289_p0 }
   0x9   :  { %297 = shalt.err (!%p294_p2)
}
   0xa   :  { %s298_s23 = scalar_lea.vmem %s28_s13, 128  ;;  %p303_p4 = scmp.lt.s32.totalorder %s28_s13, %s28_s13 }
   0xb   :  { %p299_p3 = scmp.ne.s32.totalorder %s28_s13, %s298_s23  ;;  %p304_p5 = scmp.lt.s32.totalorder %s298_s23, %s298_s23 }
   0xd   :  { %p305_p6 = por %p304_p5, %p303_p4 }
   0xf   :  { %p306_p7 = pnand %p305_p6, %p299_p3 }
  0x11   :  { %309 = shalt.err (!%p306_p7)
}
  0x12   :  { %30 = dma.hbm_to_vmem [thread:$0]  %s559_s1, 128, %s28_s13, [#allocation6]  }
  0x13   :  { %s310_s28 = scalar_lea.hbm %s558_s0, 128 }
  0x14   :  { %p311_p8 = scmp.ne.s32.totalorder %s558_s0, %s310_s28  ;;  %p314_p9 = scmp.lt.u32.totalorder %s310_s28, %s558_s0 }
  0x16   :  { %p316_p10 = pnand %p314_p9, %p311_p8 }
  0x18   :  { %319 = shalt.err (!%p316_p10)
}
  0x19   :  { %s320_s6 = scalar_lea.vmem %s18_s15, 128  ;;  %p325_p12 = scmp.lt.s32.totalorder %s18_s15, %s18_s15 }
  0x1a   :  { %p321_p11 = scmp.ne.s32.totalorder %s18_s15, %s320_s6  ;;  %p326_p13 = scmp.lt.s32.totalorder %s320_s6, %s320_s6 }
  0x1c   :  { %p327_p0 = por %p326_p13, %p325_p12 }
  0x1e   :  { %p328_p1 = pnand %p327_p0, %p321_p11 }
  0x20   :  { %331 = shalt.err (!%p328_p1)
}
  0x21   :  { %20 = dma.hbm_to_vmem [thread:$0]  %s558_s0, 128, %s18_s15, [#allocation3]  }
  0x22   :  { %s384_s8 = smov [#allocation7]   ;;  %s332_s12 = scalar_lea.hbm %s560_s2, 4096 }
  0x23   :  { %s36_s9 = sshll.u32 %s384_s8, 4  ;;  %p333_p2 = scmp.ne.s32.totalorder %s560_s2, %s332_s12  ;;  %s37_s9 = int_to_ptr.vmem [resolvable:$true] %s36_s9 }
  0x24   :  { %p336_p3 = scmp.lt.u32.totalorder %s332_s12, %s560_s2 }
  0x26   :  { %p338_p4 = pnand %p336_p3, %p333_p2 }
  0x28   :  { %341 = shalt.err (!%p338_p4)
}
  0x29   :  { %s342_s18 = scalar_lea.vmem %s37_s9, 4096  ;;  %p347_p6 = scmp.lt.s32.totalorder %s37_s9, %s37_s9 }
  0x2a   :  { %p343_p5 = scmp.ne.s32.totalorder %s37_s9, %s342_s18  ;;  %p348_p7 = scmp.lt.s32.totalorder %s342_s18, %s342_s18 }
  0x2c   :  { %p349_p8 = por %p348_p7, %p347_p6 }
  0x2e   :  { %p350_p9 = pnand %p349_p8, %p343_p5 }
  0x30   :  { %353 = shalt.err (!%p350_p9)
}
  0x31   :  { %s385_s0 = smov 1024   ;;  %s386_s15 = smov 64  }
  0x32   :  { %42 = dma.hbm_to_vmem [thread:$0]  %s560_s2, 4096, %s37_s9, [#allocation6], %s385_s0, %s385_s0, %s386_s15  }
  0x33   :  { %376 = dma.done.wait [#allocation3], 128  }
  0x34   :  { %377 = vsyncadd [#allocation3], 4294967168 }
  0x35   :  { %378 = dma.done.wait [#allocation6], 4224  }
  0x36   :  { %379 = vsyncadd [#allocation6], 4294963072  ;;  %v86_v0 = vlaneseq  ;;  %v52_v7 = vld [vmem:[#allocation7] sm:$0xff]  ;;  %v84_v8 = vld [vmem:[#allocation2] sm:$0xff]  ;;  %s387_s2 = smov [#allocation8]  }
  0x37   :  { %v158_v9 = vld [vmem:[#allocation5] sm:$0xff]  ;;  %v53_v15 = vld [vmem:[#allocation7 + $0x8] sm:$0xff]  ;;  %v54_v18 = vld [vmem:[#allocation7 + $0x10] sm:$0xff]  ;;  %s269_s21 = sshll.u32 %s387_s2, 4  ;;  %s270_s21 = int_to_ptr.vmem [resolvable:$true] %s269_s21 }
  0x38   :  { %v87_v1 = vshrl.u32 %v86_v0, 7  ;;  %v55_v19 = vld [vmem:[#allocation7 + $0x18] sm:$0xff]  ;;  %v56_v24 = vld [vmem:[#allocation7 + $0x20] sm:$0xff]  ;;  %v57_v29 = vld [vmem:[#allocation7 + $0x28] sm:$0xff]  ;;  %s354_s22 = scalar_lea.vmem %s270_s21, 4096  ;;  %p359_p11 = scmp.lt.s32.totalorder %s270_s21, %s270_s21 }
  0x39   :  { %v58_v34 = vld [vmem:[#allocation7 + $0x30] sm:$0xff]  ;;  %v60_v39 = vld [vmem:[#allocation7 + $0x40] sm:$0xff]  ;;  %v61_v40 = vld [vmem:[#allocation7 + $0x48] sm:$0xff]  ;;  %p355_p10 = scmp.ne.s32.totalorder %s270_s21, %s354_s22  ;;  %p360_p12 = scmp.lt.s32.totalorder %s354_s22, %s354_s22 }
  0x3a   :  { %v88_v2 = vsub.s32 0, %v87_v1  ;;  %v92_v3 = vsub.s32 1, %v87_v1  ;;  %v96_v4 = vsub.s32 2, %v87_v1  ;;  %v100_v5 = vsub.s32 3, %v87_v1  ;;  %v62_v41 = vld [vmem:[#allocation7 + $0x50] sm:$0xff]  ;;  %v59_v46 = vld [vmem:[#allocation7 + $0x38] sm:$0xff] }
  0x3b   :  { %v104_v6 = vsub.s32 4, %v87_v1  ;;  %v108_v10 = vsub.s32 5, %v87_v1  ;;  %v112_v11 = vsub.s32 6, %v87_v1  ;;  %v116_v12 = vsub.s32 7, %v87_v1  ;;  %v63_v47 = vld [vmem:[#allocation7 + $0x58] sm:$0xff]  ;;  %v64_v48 = vld [vmem:[#allocation7 + $0x60] sm:$0xff]  ;;  %p361_p13 = por %p360_p12, %p359_p11 }
  0x3c   :  { %v447_v13 = vrot.slane %v84_v8, %v88_v2  ;;  %v449_v14 = vrot.slane %v158_v9, %v88_v2  ;;  %v451_v16 = vrot.slane %v84_v8, %v92_v3  ;;  %v453_v17 = vrot.slane %v158_v9, %v92_v3  ;;  %v65_v53 = vld [vmem:[#allocation7 + $0x68] sm:$0xff]  ;;  %v66_v58 = vld [vmem:[#allocation7 + $0x70] sm:$0xff]  ;;  %v67_v63 = vld [vmem:[#allocation7 + $0x78] sm:$0xff] }
  0x3d   :  { %v455_v20 = vrot.slane %v84_v8, %v96_v4  ;;  %v457_v21 = vrot.slane %v158_v9, %v96_v4  ;;  %v459_v22 = vrot.slane %v84_v8, %v100_v5  ;;  %v461_v23 = vrot.slane %v158_v9, %v100_v5  ;;  %v68_v0 = vld [vmem:[#allocation7 + $0x80] sm:$0xff]  ;;  %v69_v1 = vld [vmem:[#allocation7 + $0x88] sm:$0xff]  ;;  %p362_p0 = pnand %p361_p13, %p355_p10 }
  0x3e   :  { %v126_v25 = vmax.f32 %v52_v7, %v447_v13  ;;  %v127_v26 = vmax.f32 %v53_v15, %v451_v16  ;;  %v465_v27 = vrot.slane %v84_v8, %v104_v6  ;;  %v467_v28 = vrot.slane %v158_v9, %v104_v6  ;;  %v70_v6 = vld [vmem:[#allocation7 + $0x90] sm:$0xff]  ;;  %v71_v7 = vld [vmem:[#allocation7 + $0x98] sm:$0xff]  ;;  %v73_v15 = vld [vmem:[#allocation7 + $0xa8] sm:$0xff] }
  0x3f   :  { %v128_v30 = vmax.f32 %v54_v18, %v455_v20  ;;  %v129_v31 = vmax.f32 %v55_v19, %v459_v22  ;;  %v471_v32 = vrot.slane %v84_v8, %v108_v10  ;;  %v473_v33 = vrot.slane %v158_v9, %v108_v10 }
  0x40   :  { %v200_v35 = vmin.f32 %v126_v25, %v449_v14  ;;  %v201_v36 = vmin.f32 %v127_v26, %v453_v17  ;;  %v130_v37 = vmax.f32 %v56_v24, %v465_v27  ;;  %v478_v38 = vrot.slane %v84_v8, %v112_v11  ;;  %v74_v26 = vld [vmem:[#allocation7 + $0xb0] sm:$0xff] }
  0x41   :  { %v202_v42 = vmin.f32 %v128_v30, %v457_v21  ;;  %v203_v43 = vmin.f32 %v129_v31, %v461_v23  ;;  %v131_v44 = vmax.f32 %v57_v29, %v471_v32  ;;  %v483_v45 = vrot.slane %v158_v9, %v112_v11 }
  0x42   :  { %232 = vst [vmem:[#allocation8] sm:$0xff] %v200_v35  ;;  %233 = vst [vmem:[#allocation8 + $0x8] sm:$0xff] %v201_v36  ;;  %v204_v49 = vmin.f32 %v130_v37, %v467_v28  ;;  %v132_v50 = vmax.f32 %v58_v34, %v478_v38  ;;  %v487_v51 = vrot.slane %v84_v8, %v116_v12  ;;  %v72_v8 = vld [vmem:[#allocation7 + $0xa0] sm:$0xff]  ;;  %v75_v35 = vld [vmem:[#allocation7 + $0xb8] sm:$0xff] }
  0x43   :  { %v489_v52 = vrot.slane %v158_v9, %v116_v12  ;;  %234 = vst [vmem:[#allocation8 + $0x10] sm:$0xff] %v202_v42  ;;  %235 = vst [vmem:[#allocation8 + $0x18] sm:$0xff] %v203_v43  ;;  %v205_v54 = vmin.f32 %v131_v44, %v473_v33  ;;  %v134_v55 = vmax.f32 %v60_v39, %v447_v13  ;;  %v76_v36 = vld [vmem:[#allocation7 + $0xc0] sm:$0xff]  ;;  %v77_v37 = vld [vmem:[#allocation7 + $0xc8] sm:$0xff] }
  0x44   :  { %v135_v56 = vmax.f32 %v61_v40, %v451_v16  ;;  %v136_v57 = vmax.f32 %v62_v41, %v455_v20  ;;  %236 = vst [vmem:[#allocation8 + $0x20] sm:$0xff] %v204_v49  ;;  %v206_v59 = vmin.f32 %v132_v50, %v483_v45  ;;  %v133_v60 = vmax.f32 %v59_v46, %v487_v51  ;;  %v78_v43 = vld [vmem:[#allocation7 + $0xd0] sm:$0xff]  ;;  %v79_v44 = vld [vmem:[#allocation7 + $0xd8] sm:$0xff]  ;;  %v80_v46 = vld [vmem:[#allocation7 + $0xe0] sm:$0xff] }
  0x45   :  { %v137_v61 = vmax.f32 %v63_v47, %v459_v22  ;;  %v138_v62 = vmax.f32 %v64_v48, %v465_v27  ;;  %237 = vst [vmem:[#allocation8 + $0x28] sm:$0xff] %v205_v54  ;;  %v208_v2 = vmin.f32 %v134_v55, %v449_v14  ;;  %v139_v5 = vmax.f32 %v65_v53, %v471_v32  ;;  %v81_v53 = vld [vmem:[#allocation7 + $0xe8] sm:$0xff] }
  0x46   :  { %v209_v3 = vmin.f32 %v135_v56, %v453_v17  ;;  %v210_v4 = vmin.f32 %v136_v57, %v457_v21  ;;  %238 = vst [vmem:[#allocation8 + $0x30] sm:$0xff] %v206_v59  ;;  %v207_v9 = vmin.f32 %v133_v60, %v489_v52  ;;  %v140_v12 = vmax.f32 %v66_v58, %v478_v38  ;;  %v82_v58 = vld [vmem:[#allocation7 + $0xf0] sm:$0xff] }
  0x47   :  { %v211_v10 = vmin.f32 %v137_v61, %v461_v23  ;;  %v212_v11 = vmin.f32 %v138_v62, %v467_v28  ;;  %240 = vst [vmem:[#allocation8 + $0x40] sm:$0xff] %v208_v2  ;;  %v213_v18 = vmin.f32 %v139_v5, %v473_v33  ;;  %v141_v19 = vmax.f32 %v67_v63, %v487_v51  ;;  %v83_v63 = vld [vmem:[#allocation7 + $0xf8] sm:$0xff] }
  0x48   :  { %241 = vst [vmem:[#allocation8 + $0x48] sm:$0xff] %v209_v3  ;;  %242 = vst [vmem:[#allocation8 + $0x50] sm:$0xff] %v210_v4  ;;  %v142_v24 = vmax.f32 %v68_v0, %v447_v13  ;;  %v143_v25 = vmax.f32 %v69_v1, %v451_v16  ;;  %v214_v29 = vmin.f32 %v140_v12, %v483_v45 }
  0x49   :  { %239 = vst [vmem:[#allocation8 + $0x38] sm:$0xff] %v207_v9  ;;  %243 = vst [vmem:[#allocation8 + $0x58] sm:$0xff] %v211_v10  ;;  %v144_v30 = vmax.f32 %v70_v6, %v455_v20  ;;  %v145_v31 = vmax.f32 %v71_v7, %v459_v22  ;;  %v146_v34 = vmax.f32 %v72_v8, %v465_v27 }
  0x4a   :  { %244 = vst [vmem:[#allocation8 + $0x60] sm:$0xff] %v212_v11  ;;  %245 = vst [vmem:[#allocation8 + $0x68] sm:$0xff] %v213_v18  ;;  %v215_v39 = vmin.f32 %v141_v19, %v489_v52  ;;  %v216_v40 = vmin.f32 %v142_v24, %v449_v14  ;;  %v217_v41 = vmin.f32 %v143_v25, %v453_v17 }
  0x4b   :  { %v147_v42 = vmax.f32 %v73_v15, %v471_v32  ;;  %246 = vst [vmem:[#allocation8 + $0x70] sm:$0xff] %v214_v29  ;;  %v218_v47 = vmin.f32 %v144_v30, %v457_v21  ;;  %v219_v48 = vmin.f32 %v145_v31, %v461_v23  ;;  %v220_v49 = vmin.f32 %v146_v34, %v467_v28 }
  0x4c   :  { %v148_v50 = vmax.f32 %v74_v26, %v478_v38  ;;  %247 = vst [vmem:[#allocation8 + $0x78] sm:$0xff] %v215_v39  ;;  %248 = vst [vmem:[#allocation8 + $0x80] sm:$0xff] %v216_v40  ;;  %v149_v55 = vmax.f32 %v75_v35, %v487_v51  ;;  %v150_v56 = vmax.f32 %v76_v36, %v447_v13 }
  0x4d   :  { %249 = vst [vmem:[#allocation8 + $0x88] sm:$0xff] %v217_v41  ;;  %v221_v54 = vmin.f32 %v147_v42, %v473_v33  ;;  %v151_v57 = vmax.f32 %v77_v37, %v451_v16  ;;  %250 = vst [vmem:[#allocation8 + $0x90] sm:$0xff] %v218_v47  ;;  %v152_v60 = vmax.f32 %v78_v43, %v455_v20 }
  0x4e   :  { %251 = vst [vmem:[#allocation8 + $0x98] sm:$0xff] %v219_v48  ;;  %252 = vst [vmem:[#allocation8 + $0xa0] sm:$0xff] %v220_v49  ;;  %v222_v59 = vmin.f32 %v148_v50, %v483_v45  ;;  %v153_v61 = vmax.f32 %v79_v44, %v459_v22  ;;  %v154_v62 = vmax.f32 %v80_v46, %v465_v27 }
  0x4f   :  { %253 = vst [vmem:[#allocation8 + $0xa8] sm:$0xff] %v221_v54  ;;  %v223_v0 = vmin.f32 %v149_v55, %v489_v52  ;;  %v224_v13 = vmin.f32 %v150_v56, %v449_v14  ;;  %v225_v16 = vmin.f32 %v151_v57, %v453_v17  ;;  %v155_v1 = vmax.f32 %v81_v53, %v471_v32 }
  0x50   :  { %254 = vst [vmem:[#allocation8 + $0xb0] sm:$0xff] %v222_v59  ;;  %v226_v2 = vmin.f32 %v152_v60, %v457_v21  ;;  %v227_v3 = vmin.f32 %v153_v61, %v461_v23  ;;  %v228_v20 = vmin.f32 %v154_v62, %v467_v28  ;;  %v156_v22 = vmax.f32 %v82_v58, %v478_v38 }
  0x51   :  { %255 = vst [vmem:[#allocation8 + $0xb8] sm:$0xff] %v223_v0  ;;  %256 = vst [vmem:[#allocation8 + $0xc0] sm:$0xff] %v224_v13  ;;  %v229_v14 = vmin.f32 %v155_v1, %v473_v33  ;;  %v157_v17 = vmax.f32 %v83_v63, %v487_v51 }
  0x52   :  { %257 = vst [vmem:[#allocation8 + $0xc8] sm:$0xff] %v225_v16  ;;  %258 = vst [vmem:[#allocation8 + $0xd0] sm:$0xff] %v226_v2  ;;  %v230_v21 = vmin.f32 %v156_v22, %v483_v45 }
  0x53   :  { %259 = vst [vmem:[#allocation8 + $0xd8] sm:$0xff] %v227_v3  ;;  %260 = vst [vmem:[#allocation8 + $0xe0] sm:$0xff] %v228_v20  ;;  %v231_v23 = vmin.f32 %v157_v17, %v489_v52 }
  0x54   :  { %261 = vst [vmem:[#allocation8 + $0xe8] sm:$0xff] %v229_v14  ;;  %262 = vst [vmem:[#allocation8 + $0xf0] sm:$0xff] %v230_v21 }
  0x55   :  { %263 = vst [vmem:[#allocation8 + $0xf8] sm:$0xff] %v231_v23 }
  0x56   :  { %365 = shalt.err (!%p362_p0)
}
  0x57   :  { %s366_s25 = scalar_lea.hbm %s561_s3, 4096 }
  0x58   :  { %p367_p1 = scmp.ne.s32.totalorder %s561_s3, %s366_s25  ;;  %p370_p2 = scmp.lt.u32.totalorder %s366_s25, %s561_s3 }
  0x5a   :  { %p372_p3 = pnand %p370_p2, %p367_p1 }
  0x5c   :  { %375 = shalt.err (!%p372_p3)
}
  0x5d   :  { %275 = dma.vmem_to_hbm [thread:$0]  %s270_s21, 4096, %s561_s3, [#allocation4], %s385_s0, %s385_s0, %s386_s15  }
  0x5e   :  { %380 = dma.done.wait [#allocation4], 4096  }
  0x5f   :  { %381 = vsyncadd [#allocation4], 4294963200 }
  0x60   :  { %279 = vsyncpa [#allocation3], 1 }
  0x61   :  { %280 = vsyncpa [#allocation6], 1 }
  0x62   :  { %281 = vsyncpa [#allocation4], 1 }

</bundles_post_ra>
